<compile_context>
chip_gen: v5e
topology: v5e:2x2
jax: 0.10.0
libtpu: 0.0.40
codegen_flags: <defaults>
</compile_context>

<pallas_src>
import jax
import jax.numpy as jnp
from jax.experimental import pallas as pl
from jax.experimental.pallas import tpu as pltpu

# ---- fixed model constants (from ECC.__init__) ------------------------------
ALPHA = 216.0
N_HILL = 2.0      # Hill exponent
K_S = 20.0
ETA = 2.0
KS0 = 1.0
KS1 = 0.01
SCALE = 1.0

# ---- deterministic "parameters" of the module -------------------------------
Q_PARAM = 0.8
DELTA_BETA = 0.0

# 8 sublanes x 128 lanes = 1024 cells is the minimal dense tile unit.
_CELLS_PER_UNIT = 8 * 128
_MAX_UNITS_PER_TILE = 64          # TK <= 8192 lanes  (~1.75 MiB f32 per buffer)


def _hill(x):
    """Hill nonlinearity tied to N_HILL (x*x fast path for the default n=2)."""
    if N_HILL == 2.0:
        return x * x
    return x ** N_HILL


def _make_ecc_kernel(Q: float, delta_beta: float):
    beta = 1.0 + delta_beta

    def kernel(coup_ref, x_ref, o_ref):
        # coup_ref: (1, 1) f32 in SMEM -> precomputed SCALE * ETA * Q * mean(S)
        # x_ref, o_ref: (7, 8, TK) blocks in VMEM (species, sublanes, lanes)
        coup = coup_ref[0, 0]
        f32 = jnp.float32

        a = x_ref[0].astype(f32)
        b = x_ref[1].astype(f32)
        c = x_ref[2].astype(f32)
        A = x_ref[3].astype(f32)
        Bv = x_ref[4].astype(f32)
        C = x_ref[5].astype(f32)
        S = x_ref[6].astype(f32)

        od = o_ref.dtype
        o_ref[0] = (-a + ALPHA / (1.0 + _hill(C))).astype(od)
        o_ref[1] = (-b + ALPHA / (1.0 + _hill(A))).astype(od)
        o_ref[2] = (-c + ALPHA / (1.0 + _hill(Bv))
                    + K_S * S / (SCALE + S)).astype(od)
        o_ref[3] = (beta * (a - A)).astype(od)
        o_ref[4] = (beta * (b - Bv)).astype(od)
        o_ref[5] = (beta * (c - C)).astype(od)
        # SCALE*(-ks0*S + ks1*A - eta*(S - Q*mean)) with the mean term folded
        # into the precomputed scalar `coup`.
        o_ref[6] = (SCALE * (KS1 * A - (KS0 + ETA) * S) + coup).astype(od)

    return kernel


def _choose_units_per_tile(n_units: int) -> int:
    """Pick 1024-cell units per tile: bound padding, keep >=2 grid steps.

    - caps the tile at _MAX_UNITS_PER_TILE units (TK = 8192 lanes),
    - forces at least two grid steps when possible (DMA/compute overlap and
      v7x megacore sharding of the "parallel" axis),
    - among candidate tile sizes in [hi/2, hi], picks the one with the least
      padding (ties -> larger tile), so mid-sized cell counts no longer pad
      up by ~a whole tile.
    """
    if n_units <= 1:
        return 1
    hi = min(_MAX_UNITS_PER_TILE, -(-n_units // 2))   # cdiv -> >=2 grid steps
    hi = max(hi, 1)
    lo = max(1, hi // 2)
    best_upt, best_pad = hi, None
    for upt in range(hi, lo - 1, -1):
        pad = (-(-n_units // upt)) * upt - n_units
        if best_pad is None or pad < best_pad:
            best_upt, best_pad = upt, pad
            if pad == 0:
                break
    return best_upt


def ecc_rhs_species_major(x_sp, Q=Q_PARAM, delta_beta=DELTA_BETA, s_mean=None):
    """RHS on species-major state x_sp of shape (7, N) with N = batch*cells.

    This is the fast path (~1 read + 1 write of the state, no layout
    plumbing).  ODE solvers that keep their state persistently in this layout
    should call it directly.  `s_mean` (global mean of the S species, any
    float dtype) may be supplied to avoid recomputing it.
    """
    seven, n = x_sp.shape
    assert seven == 7

    if s_mean is None:
        s_mean = jnp.mean(x_sp[6].astype(jnp.float32))
    coup = (jnp.float32(SCALE * ETA * Q)
            * s_mean.astype(jnp.float32)).reshape(1, 1)

    n_units = -(-n // _CELLS_PER_UNIT)
    upt = _choose_units_per_tile(n_units)
    tk = upt * 128                       # lanes per tile
    cells_per_tile = 8 * tk
    num_tiles = -(-n_units // upt)
    n_pad = num_tiles * cells_per_tile

    xp = x_sp if n_pad == n else jnp.pad(x_sp, ((0, 0), (0, n_pad - n)))
    x3 = xp.reshape(7, 8, n_pad // 8)    # contiguous split of the cell axis

    out3 = pl.pallas_call(
        _make_ecc_kernel(Q, delta_beta),
        out_shape=jax.ShapeDtypeStruct((7, 8, n_pad // 8), x_sp.dtype),
        grid=(num_tiles,),
        in_specs=[
            pl.BlockSpec(memory_space=pltpu.MemorySpace.SMEM),   # coupling scalar
            pl.BlockSpec((7, 8, tk), lambda i: (0, 0, i)),        # state tile
        ],
        out_specs=pl.BlockSpec((7, 8, tk), lambda i: (0, 0, i)),
        compiler_params=pltpu.CompilerParams(
            dimension_semantics=("parallel",),
            vmem_limit_bytes=32 * 1024 * 1024,
        ),
    )(coup, x3)

    out = out3.reshape(7, n_pad)
    return out if n_pad == n else out[:, :n]


def ecc_forward(t, state, Q=Q_PARAM, delta_beta=DELTA_BETA):
    """Pallas implementation of ECC.forward(t, state). `t` is unused.

    state: (B, L) with L = 7*M, species interleaved (a,b,c,A,B,C,S, ...).
    """
    del t
    B, L = state.shape
    assert L % 7 == 0, "state length must be a multiple of 7"
    M = L // 7

    # Quorum mean computed from the interleaved layout so it neither
    # serializes behind the transpose below nor depends on it.
    s_mean = jnp.mean(state[:, 6::7].astype(jnp.float32))

    # TODO(synk): ODE solvers should keep their state species-major as
    # (7, B*M) and call ecc_rhs_species_major directly; the two stride-7
    # transposes below are pure layout plumbing and cost ~2 extra full HBM
    # passes per RHS evaluation (the kernel itself is ~1 pass each way).
    x_sp = state.reshape(B, M, 7).transpose(2, 0, 1).reshape(7, B * M)
    out_sp = ecc_rhs_species_major(x_sp, Q=Q, delta_beta=delta_beta,
                                   s_mean=s_mean)
    return out_sp.reshape(7, B, M).transpose(1, 2, 0).reshape(B, L)


def _ecc_forward_ref(t, state, Q=Q_PARAM, delta_beta=DELTA_BETA):
    """Pure-JAX reference mirroring the PyTorch code, for verification."""
    del t
    beta = 1.0 + delta_beta
    L = state.shape[1]
    a = state[:, 0:L:7]
    b = state[:, 1:L:7]
    c = state[:, 2:L:7]
    A = state[:, 3:L:7]
    Bv = state[:, 4:L:7]
    C = state[:, 5:L:7]
    S = state[:, 6:L:7]
    dstate = jnp.zeros_like(state)
    dstate = dstate.at[:, 0:L:7].set(-a + ALPHA / (1.0 + C ** N_HILL))
    dstate = dstate.at[:, 1:L:7].set(-b + ALPHA / (1.0 + A ** N_HILL))
    dstate = dstate.at[:, 2:L:7].set(
        -c + ALPHA / (1.0 + Bv ** N_HILL) + K_S * S / (SCALE + S))
    dstate = dstate.at[:, 3:L:7].set(beta * (a - A))
    dstate = dstate.at[:, 4:L:7].set(beta * (b - Bv))
    dstate = dstate.at[:, 5:L:7].set(beta * (c - C))
    dstate = dstate.at[:, 6:L:7].set(
        SCALE * (-KS0 * S + KS1 * A - ETA * (S - Q * jnp.mean(S))))
    return dstate


if __name__ == "__main__":
    key = jax.random.PRNGKey(0)
    k1, k2 = jax.random.split(key)
    t = jnp.float32(0.0)
    fwd = jax.jit(ecc_forward)

    # Small shape consistent with the module: batch=2, 16 cells -> L = 112.
    B, M = 2, 16
    L = 7 * M
    state = jax.random.uniform(k1, (B, L), dtype=jnp.float32,
                               minval=0.1, maxval=2.0)
    dstate = jax.block_until_ready(fwd(t, state))
    ref = _ecc_forward_ref(t, state)
    assert dstate.shape == state.shape and dstate.dtype == state.dtype
    assert jnp.allclose(dstate, ref, rtol=1e-5, atol=1e-5)

    # Larger case: batch=4, 3000 cells -> 12000 cells total. Exercises the
    # multi-tile grid (2 tiles of 6144 cells, ~2.4% padding) and the
    # global-mean / padding path.
    B2, M2 = 4, 3000
    L2 = 7 * M2
    state2 = jax.random.uniform(k2, (B2, L2), dtype=jnp.float32,
                                minval=0.1, maxval=2.0)
    dstate2 = jax.block_until_ready(fwd(t, state2))
    ref2 = _ecc_forward_ref(t, state2)
    assert jnp.allclose(dstate2, ref2, rtol=1e-5, atol=1e-5)

    # Species-major fast path used directly (no interleave transposes).
    x_sp = state2.reshape(B2, M2, 7).transpose(2, 0, 1).reshape(7, B2 * M2)
    out_sp = jax.block_until_ready(
        jax.jit(ecc_rhs_species_major)(x_sp))
    ref_sp = ref2.reshape(B2, M2, 7).transpose(2, 0, 1).reshape(7, B2 * M2)
    assert jnp.allclose(out_sp, ref_sp, rtol=1e-5, atol=1e-5)

    print("KERNEL_OK")
</pallas_src>

<mosaic_0001>
module attributes {stable_mosaic.version = 11 : i64} {
  func.func @kernel(%arg0: i32, %arg1: memref<1x1xf32, #tpu.memory_space<smem>>, %arg2: memref<7x8x128xf32, #tpu.memory_space<vmem>>, %arg3: memref<7x8x128xf32, #tpu.memory_space<vmem>>) attributes {dimension_semantics = [#tpu.dimension_semantics<parallel>], iteration_bounds = array<i64: 1>, scalar_prefetch = 0 : i64, scratch_operands = 0 : i64, tpu.core_type = #tpu.core_type<tc>, window_params = [{transform_indices = @transform_0, window_bounds = array<i64: 1, 1>}, {transform_indices = @transform_1, window_bounds = array<i64: 7, 8, 128>}, {transform_indices = @transform_2, window_bounds = array<i64: 7, 8, 128>}]} {
    %c0 = arith.constant 0 : index
    %c0_0 = arith.constant 0 : index
    %0 = memref.load %arg1[%c0, %c0_0] : memref<1x1xf32, #tpu.memory_space<smem>>
    %c0_1 = arith.constant 0 : index
    %c0_2 = arith.constant 0 : index
    %c0_3 = arith.constant 0 : index
    %1 = vector.load %arg2[%c0_1, %c0_2, %c0_3] : memref<7x8x128xf32, #tpu.memory_space<vmem>>, vector<1x8x128xf32>
    %2 = vector.shape_cast %1 : vector<1x8x128xf32> to vector<8x128xf32>
    %c1 = arith.constant 1 : index
    %c0_4 = arith.constant 0 : index
    %c0_5 = arith.constant 0 : index
    %3 = vector.load %arg2[%c1, %c0_4, %c0_5] : memref<7x8x128xf32, #tpu.memory_space<vmem>>, vector<1x8x128xf32>
    %4 = vector.shape_cast %3 : vector<1x8x128xf32> to vector<8x128xf32>
    %c2 = arith.constant 2 : index
    %c0_6 = arith.constant 0 : index
    %c0_7 = arith.constant 0 : index
    %5 = vector.load %arg2[%c2, %c0_6, %c0_7] : memref<7x8x128xf32, #tpu.memory_space<vmem>>, vector<1x8x128xf32>
    %6 = vector.shape_cast %5 : vector<1x8x128xf32> to vector<8x128xf32>
    %c3 = arith.constant 3 : index
    %c0_8 = arith.constant 0 : index
    %c0_9 = arith.constant 0 : index
    %7 = vector.load %arg2[%c3, %c0_8, %c0_9] : memref<7x8x128xf32, #tpu.memory_space<vmem>>, vector<1x8x128xf32>
    %8 = vector.shape_cast %7 : vector<1x8x128xf32> to vector<8x128xf32>
    %c4 = arith.constant 4 : index
    %c0_10 = arith.constant 0 : index
    %c0_11 = arith.constant 0 : index
    %9 = vector.load %arg2[%c4, %c0_10, %c0_11] : memref<7x8x128xf32, #tpu.memory_space<vmem>>, vector<1x8x128xf32>
    %10 = vector.shape_cast %9 : vector<1x8x128xf32> to vector<8x128xf32>
    %c5 = arith.constant 5 : index
    %c0_12 = arith.constant 0 : index
    %c0_13 = arith.constant 0 : index
    %11 = vector.load %arg2[%c5, %c0_12, %c0_13] : memref<7x8x128xf32, #tpu.memory_space<vmem>>, vector<1x8x128xf32>
    %12 = vector.shape_cast %11 : vector<1x8x128xf32> to vector<8x128xf32>
    %c6 = arith.constant 6 : index
    %c0_14 = arith.constant 0 : index
    %c0_15 = arith.constant 0 : index
    %13 = vector.load %arg2[%c6, %c0_14, %c0_15] : memref<7x8x128xf32, #tpu.memory_space<vmem>>, vector<1x8x128xf32>
    %14 = vector.shape_cast %13 : vector<1x8x128xf32> to vector<8x128xf32>
    %cst = arith.constant 0.000000e+00 : f32
    %15 = vector.broadcast %cst : f32 to vector<8x128xf32>
    %16 = arith.subf %15, %2 : vector<8x128xf32>
    %17 = arith.mulf %12, %12 : vector<8x128xf32>
    %cst_16 = arith.constant 1.000000e+00 : f32
    %18 = vector.broadcast %cst_16 : f32 to vector<8x128xf32>
    %19 = arith.addf %18, %17 : vector<8x128xf32>
    %cst_17 = arith.constant 2.160000e+02 : f32
    %20 = vector.broadcast %cst_17 : f32 to vector<8x128xf32>
    %21 = arith.divf %20, %19 : vector<8x128xf32>
    %22 = arith.addf %16, %21 : vector<8x128xf32>
    %c0_18 = arith.constant 0 : index
    %c0_19 = arith.constant 0 : index
    %c0_20 = arith.constant 0 : index
    %23 = vector.load %arg3[%c0_18, %c0_19, %c0_20] : memref<7x8x128xf32, #tpu.memory_space<vmem>>, vector<1x8x128xf32>
    %24 = vector.shape_cast %23 : vector<1x8x128xf32> to vector<8x128xf32>
    %25 = vector.shape_cast %22 : vector<8x128xf32> to vector<1x8x128xf32>
    tpu.vector_store %arg3[%c0_18, %c0_19, %c0_20], %25 {strides = array<i32>} : memref<7x8x128xf32, #tpu.memory_space<vmem>>, vector<1x8x128xf32>,
    %cst_21 = arith.constant 0.000000e+00 : f32
    %26 = vector.broadcast %cst_21 : f32 to vector<8x128xf32>
    %27 = arith.subf %26, %4 : vector<8x128xf32>
    %28 = arith.mulf %8, %8 : vector<8x128xf32>
    %cst_22 = arith.constant 1.000000e+00 : f32
    %29 = vector.broadcast %cst_22 : f32 to vector<8x128xf32>
    %30 = arith.addf %29, %28 : vector<8x128xf32>
    %cst_23 = arith.constant 2.160000e+02 : f32
    %31 = vector.broadcast %cst_23 : f32 to vector<8x128xf32>
    %32 = arith.divf %31, %30 : vector<8x128xf32>
    %33 = arith.addf %27, %32 : vector<8x128xf32>
    %c1_24 = arith.constant 1 : index
    %c0_25 = arith.constant 0 : index
    %c0_26 = arith.constant 0 : index
    %34 = vector.load %arg3[%c1_24, %c0_25, %c0_26] : memref<7x8x128xf32, #tpu.memory_space<vmem>>, vector<1x8x128xf32>
    %35 = vector.shape_cast %34 : vector<1x8x128xf32> to vector<8x128xf32>
    %36 = vector.shape_cast %33 : vector<8x128xf32> to vector<1x8x128xf32>
    tpu.vector_store %arg3[%c1_24, %c0_25, %c0_26], %36 {strides = array<i32>} : memref<7x8x128xf32, #tpu.memory_space<vmem>>, vector<1x8x128xf32>,
    %cst_27 = arith.constant 0.000000e+00 : f32
    %37 = vector.broadcast %cst_27 : f32 to vector<8x128xf32>
    %38 = arith.subf %37, %6 : vector<8x128xf32>
    %39 = arith.mulf %10, %10 : vector<8x128xf32>
    %cst_28 = arith.constant 1.000000e+00 : f32
    %40 = vector.broadcast %cst_28 : f32 to vector<8x128xf32>
    %41 = arith.addf %40, %39 : vector<8x128xf32>
    %cst_29 = arith.constant 2.160000e+02 : f32
    %42 = vector.broadcast %cst_29 : f32 to vector<8x128xf32>
    %43 = arith.divf %42, %41 : vector<8x128xf32>
    %44 = arith.addf %38, %43 : vector<8x128xf32>
    %cst_30 = arith.constant 2.000000e+01 : f32
    %45 = vector.broadcast %cst_30 : f32 to vector<8x128xf32>
    %46 = arith.mulf %45, %14 : vector<8x128xf32>
    %cst_31 = arith.constant 1.000000e+00 : f32
    %47 = vector.broadcast %cst_31 : f32 to vector<8x128xf32>
    %48 = arith.addf %47, %14 : vector<8x128xf32>
    %49 = arith.divf %46, %48 : vector<8x128xf32>
    %50 = arith.addf %44, %49 : vector<8x128xf32>
    %c2_32 = arith.constant 2 : index
    %c0_33 = arith.constant 0 : index
    %c0_34 = arith.constant 0 : index
    %51 = vector.load %arg3[%c2_32, %c0_33, %c0_34] : memref<7x8x128xf32, #tpu.memory_space<vmem>>, vector<1x8x128xf32>
    %52 = vector.shape_cast %51 : vector<1x8x128xf32> to vector<8x128xf32>
    %53 = vector.shape_cast %50 : vector<8x128xf32> to vector<1x8x128xf32>
    tpu.vector_store %arg3[%c2_32, %c0_33, %c0_34], %53 {strides = array<i32>} : memref<7x8x128xf32, #tpu.memory_space<vmem>>, vector<1x8x128xf32>,
    %54 = arith.subf %2, %8 : vector<8x128xf32>
    %cst_35 = arith.constant 1.000000e+00 : f32
    %55 = vector.broadcast %cst_35 : f32 to vector<8x128xf32>
    %56 = arith.mulf %55, %54 : vector<8x128xf32>
    %c3_36 = arith.constant 3 : index
    %c0_37 = arith.constant 0 : index
    %c0_38 = arith.constant 0 : index
    %57 = vector.load %arg3[%c3_36, %c0_37, %c0_38] : memref<7x8x128xf32, #tpu.memory_space<vmem>>, vector<1x8x128xf32>
    %58 = vector.shape_cast %57 : vector<1x8x128xf32> to vector<8x128xf32>
    %59 = vector.shape_cast %56 : vector<8x128xf32> to vector<1x8x128xf32>
    tpu.vector_store %arg3[%c3_36, %c0_37, %c0_38], %59 {strides = array<i32>} : memref<7x8x128xf32, #tpu.memory_space<vmem>>, vector<1x8x128xf32>,
    %60 = arith.subf %4, %10 : vector<8x128xf32>
    %cst_39 = arith.constant 1.000000e+00 : f32
    %61 = vector.broadcast %cst_39 : f32 to vector<8x128xf32>
    %62 = arith.mulf %61, %60 : vector<8x128xf32>
    %c4_40 = arith.constant 4 : index
    %c0_41 = arith.constant 0 : index
    %c0_42 = arith.constant 0 : index
    %63 = vector.load %arg3[%c4_40, %c0_41, %c0_42] : memref<7x8x128xf32, #tpu.memory_space<vmem>>, vector<1x8x128xf32>
    %64 = vector.shape_cast %63 : vector<1x8x128xf32> to vector<8x128xf32>
    %65 = vector.shape_cast %62 : vector<8x128xf32> to vector<1x8x128xf32>
    tpu.vector_store %arg3[%c4_40, %c0_41, %c0_42], %65 {strides = array<i32>} : memref<7x8x128xf32, #tpu.memory_space<vmem>>, vector<1x8x128xf32>,
    %66 = arith.subf %6, %12 : vector<8x128xf32>
    %cst_43 = arith.constant 1.000000e+00 : f32
    %67 = vector.broadcast %cst_43 : f32 to vector<8x128xf32>
    %68 = arith.mulf %67, %66 : vector<8x128xf32>
    %c5_44 = arith.constant 5 : index
    %c0_45 = arith.constant 0 : index
    %c0_46 = arith.constant 0 : index
    %69 = vector.load %arg3[%c5_44, %c0_45, %c0_46] : memref<7x8x128xf32, #tpu.memory_space<vmem>>, vector<1x8x128xf32>
    %70 = vector.shape_cast %69 : vector<1x8x128xf32> to vector<8x128xf32>
    %71 = vector.shape_cast %68 : vector<8x128xf32> to vector<1x8x128xf32>
    tpu.vector_store %arg3[%c5_44, %c0_45, %c0_46], %71 {strides = array<i32>} : memref<7x8x128xf32, #tpu.memory_space<vmem>>, vector<1x8x128xf32>,
    %cst_47 = arith.constant 0.00999999977 : f32
    %72 = vector.broadcast %cst_47 : f32 to vector<8x128xf32>
    %73 = arith.mulf %72, %8 : vector<8x128xf32>
    %cst_48 = arith.constant 3.000000e+00 : f32
    %74 = vector.broadcast %cst_48 : f32 to vector<8x128xf32>
    %75 = arith.mulf %74, %14 : vector<8x128xf32>
    %76 = arith.subf %73, %75 : vector<8x128xf32>
    %cst_49 = arith.constant 1.000000e+00 : f32
    %77 = vector.broadcast %cst_49 : f32 to vector<8x128xf32>
    %78 = arith.mulf %77, %76 : vector<8x128xf32>
    %79 = vector.broadcast %0 : f32 to vector<8x128xf32>
    %80 = arith.addf %78, %79 : vector<8x128xf32>
    %c6_50 = arith.constant 6 : index
    %c0_51 = arith.constant 0 : index
    %c0_52 = arith.constant 0 : index
    %81 = vector.load %arg3[%c6_50, %c0_51, %c0_52] : memref<7x8x128xf32, #tpu.memory_space<vmem>>, vector<1x8x128xf32>
    %82 = vector.shape_cast %81 : vector<1x8x128xf32> to vector<8x128xf32>
    %83 = vector.shape_cast %80 : vector<8x128xf32> to vector<1x8x128xf32>
    tpu.vector_store %arg3[%c6_50, %c0_51, %c0_52], %83 {strides = array<i32>} : memref<7x8x128xf32, #tpu.memory_space<vmem>>, vector<1x8x128xf32>,
    return
  }
  func.func @transform_0(%arg0: i32) -> (i32, i32) {
    %c0_i32 = arith.constant 0 : i32
    %c0_i32_0 = arith.constant 0 : i32
    %c0_i32_1 = arith.constant 0 : i32
    return %c0_i32, %c0_i32_0 : i32, i32
  }
  func.func @transform_1(%arg0: i32) -> (i32, i32, i32) {
    %c0_i32 = arith.constant 0 : i32
    %c0_i32_0 = arith.constant 0 : i32
    %c0_i32_1 = arith.constant 0 : i32
    return %c0_i32, %c0_i32_0, %arg0 : i32, i32, i32
  }
  func.func @transform_2(%arg0: i32) -> (i32, i32, i32) {
    %c0_i32 = arith.constant 0 : i32
    %c0_i32_0 = arith.constant 0 : i32
    %c0_i32_1 = arith.constant 0 : i32
    return %c0_i32, %c0_i32_0, %arg0 : i32, i32, i32
  }
}

</mosaic_0001>

<bundles_post_ra>
// kernel: ecc_forward.1
= control target key start
LH: loop header
LB: loop body
LE: loop exit
PB: predicated region body
PF: predicated region fallthrough
CT: control target
= control target key end

     0   :  { %s270_s1 = inlined_call_operand.vmem [shape: f32[7,8,128], index: 1, kind: input, shape index: {}]   ;;  %s271_s2 = inlined_call_operand.vmem [shape: f32[7,8,128], index: 2, kind: output, shape index: {}]   ;;  %s272_s0 = inlined_call_operand.<no memory space> [shape: f32[1,1], index: 0, kind: input, shape index: {}]  }
   0x1   :  { %v130_v0 = vld [vmem:[%s270_s1 + $0x28] sm:$0xff]  ;;  %v167_v1 = vld [vmem:[%s270_s1] sm:$0xff]  ;;  %v128_v3 = vld [vmem:[%s270_s1 + $0x18] sm:$0xff]  ;;  %v118_v23 = vstv %s272_s0 }
   0x2   :  { %v27_v2 = vmul.f32 %v130_v0, %v130_v0  ;;  %v129_v4 = vld [vmem:[%s270_s1 + $0x20] sm:$0xff]  ;;  %v178_v5 = vld [vmem:[%s270_s1 + $0x8] sm:$0xff]  ;;  %v47_v6 = vmul.f32 %v128_v3, %v128_v3  ;;  %v183_v7 = vld [vmem:[%s270_s1 + $0x30] sm:$0xff]  ;;  %v106_v9 = vsub.f32 %v167_v1, %v128_v3  ;;  %v115_v18 = vmul.f32 0.01, %v128_v3 }
   0x3   :  { %v68_v8 = vmul.f32 %v129_v4, %v129_v4  ;;  %v189_v11 = vld [vmem:[%s270_s1 + $0x10] sm:$0xff]  ;;  %v109_v12 = vsub.f32 %v178_v5, %v129_v4  ;;  %v199_v16 = vadd.f32 1.0, %v183_v7  ;;  %v26_v21 = vsub.f32 0.0, %v167_v1 }
   0x4   :  { %v28_v10 = vadd.f32 1.0, %v27_v2  ;;  %v48_v13 = vadd.f32 1.0, %v47_v6  ;;  %134 = vst [vmem:[%s271_s2 + $0x18] sm:$0xff] %v106_v9  ;;  %v112_v15 = vsub.f32 %v189_v11, %v130_v0  ;;  %v116_v22 = vmul.f32 3.0, %v183_v7 }
   0x5   :  { %v192_v14 = vadd.f32 1.0, %v68_v8  ;;  %135 = vst [vmem:[%s271_s2 + $0x20] sm:$0xff] %v109_v12  ;;  %v46_v25 = vsub.f32 0.0, %v178_v5  ;;  %v67_v26 = vsub.f32 0.0, %v189_v11  ;;  %vm93_vm8 = vweird.f32 %v199_v16 }
   0x6   :  { %138 = vrcp.f32 %v28_v10  ;;  %136 = vst [vmem:[%s271_s2 + $0x28] sm:$0xff] %v112_v15  ;;  %v38_v17 = vand.u32 2147483647, %v28_v10  ;;  %v40_v19 = vand.u32 2147483648, %v28_v10  ;;  %v60_v20 = vand.u32 2147483648, %v48_v13 }
   0x7   :  { %140 = vrcp.f32 %v48_v13  ;;  %vm34_vm0 = vweird.f32 %v28_v10  ;;  %vm54_vm1 = vweird.f32 %v48_v13  ;;  %v58_v30 = vand.u32 2147483647, %v48_v13 }
   0x8   :  { %142 = vrcp.f32 %v192_v14  ;;  %vm216_vm2 = vcmp.eq.f32.partialorder %v38_v17, 8.507059e+37  ;;  %v117_v31 = vsub.f32 %v115_v18, %v116_v22  ;;  %v41_v33 = vor.u32 1.1754944e-38, %v40_v19 }
   0x9   :  { %144 = vrcp.f32 %v199_v16  ;;  %v61_v35 = vor.u32 1.1754944e-38, %v60_v20  ;;  %vm75_vm3 = vweird.f32 %v192_v14  ;;  %v79_v41 = vand.u32 2147483647, %v192_v14 }
   0xa   :  { %v119_v38 = vadd.f32 %v118_v23, %v117_v31  ;;  %v81_v42 = vand.u32 2147483648, %v192_v14  ;;  %v97_v48 = vand.u32 2147483647, %v199_v16  ;;  %v99_v49 = vand.u32 2147483648, %v199_v16 }
   0xb   :  { %vm59_vm11 = vcmp.eq.f32.partialorder %v58_v30, 8.507059e+37  ;;  %v86_v57 = vmul.f32 20.0, %v183_v7  ;;  %vm80_vm13 = vcmp.eq.f32.partialorder %v79_v41, 8.507059e+37 }
   0xc   :  { %v139_v24 = vpop.eup %138  ;;  %137 = vst [vmem:[%s271_s2 + $0x30] sm:$0xff] %v119_v38  ;;  %v82_v56 = vor.u32 1.1754944e-38, %v81_v42  ;;  %vm98_vm15 = vcmp.eq.f32.partialorder %v97_v48, 8.507059e+37  ;;  %v100_v63 = vor.u32 1.1754944e-38, %v99_v49 }
   0xd   :  { %v141_v27 = vpop.eup %140  ;;  %v30_v28 = vmul.f32 %v139_v24, %v28_v10  ;;  %vm35_vm4 = vweird.f32 %v139_v24 }
   0xe   :  { %v143_v32 = vpop.eup %142  ;;  %v50_v34 = vmul.f32 %v141_v27, %v48_v13  ;;  %vm55_vm5 = vweird.f32 %v141_v27  ;;  %vm229_vm7 = vmor %vm34_vm0, %vm35_vm4 }
   0xf   :  { %v31_v36 = vsub.f32 1.0, %v30_v28  ;;  %v71_v37 = vmul.f32 %v143_v32, %v192_v14  ;;  %v145_v39 = vpop.eup %144  ;;  %vm76_vm6 = vweird.f32 %v143_v32  ;;  %vm237_vm9 = vmor %vm54_vm1, %vm55_vm5 }
  0x10   :  { %v51_v40 = vsub.f32 1.0, %v50_v34  ;;  %v89_v45 = vmul.f32 %v145_v39, %v199_v16  ;;  %vm94_vm10 = vweird.f32 %v145_v39  ;;  %vm244_vm12 = vmor %vm75_vm3, %vm76_vm6 }
  0x11   :  { %v32_v43 = vmul.f32 %v139_v24, %v31_v36  ;;  %v72_v44 = vsub.f32 1.0, %v71_v37  ;;  %vm95_vm14 = vmor %vm93_vm8, %vm94_vm10 }
  0x12   :  { %v52_v47 = vmul.f32 %v141_v27, %v51_v40  ;;  %v90_v53 = vsub.f32 1.0, %v89_v45 }
  0x13   :  { %v33_v50 = vadd.f32 %v139_v24, %v32_v43  ;;  %v73_v52 = vmul.f32 %v143_v32, %v72_v44 }
  0x14   :  { %v53_v54 = vadd.f32 %v141_v27, %v52_v47  ;;  %v91_v60 = vmul.f32 %v145_v39, %v90_v53 }
  0x15   :  { %v37_v58 = vsel %vm229_vm7, %v139_v24, %v33_v50  ;;  %v74_v59 = vadd.f32 %v143_v32, %v73_v52 }
  0x16   :  { %v42_v61 = vsel %vm216_vm2, %v41_v33, %v37_v58  ;;  %v57_v62 = vsel %vm237_vm9, %v141_v27, %v53_v54  ;;  %v92_v4 = vadd.f32 %v145_v39, %v91_v60 }
  0x17   :  { %v43_v0 = vmul.f32 216.0, %v42_v61  ;;  %v62_v2 = vsel %vm59_vm11, %v61_v35, %v57_v62  ;;  %v78_v3 = vsel %vm244_vm12, %v143_v32, %v74_v59 }
  0x18   :  { %v63_v5 = vmul.f32 216.0, %v62_v2  ;;  %v83_v6 = vsel %vm80_vm13, %v82_v56, %v78_v3  ;;  %v96_v9 = vsel %vm95_vm14, %v145_v39, %v92_v4 }
  0x19   :  { %v44_v7 = vadd.f32 %v43_v0, %v26_v21  ;;  %v84_v8 = vmul.f32 216.0, %v83_v6  ;;  %v101_v11 = vsel %vm98_vm15, %v100_v63, %v96_v9 }
  0x1a   :  { %v64_v10 = vadd.f32 %v63_v5, %v46_v25  ;;  %v102_v13 = vmul.f32 %v101_v11, %v86_v57 }
  0x1b   :  { %45 = vst [vmem:[%s271_s2] sm:$0xff] %v44_v7  ;;  %v85_v12 = vadd.f32 %v84_v8, %v67_v26 }
  0x1c   :  { %132 = vst [vmem:[%s271_s2 + $0x8] sm:$0xff] %v64_v10 }
  0x1d   :  { %v103_v14 = vadd.f32 %v102_v13, %v85_v12 }
  0x1f   :  { %133 = vst [vmem:[%s271_s2 + $0x10] sm:$0xff] %v103_v14 }

</bundles_post_ra>
